<compile_context>
chip_gen: v7x
topology: tpu7x:2x2x1
jax: 0.10.0
libtpu: 0.0.40
codegen_flags: <defaults>
</compile_context>

<pallas_src>
import functools

import jax
import jax.numpy as jnp
import numpy as np
from jax.experimental import pallas as pl
from jax.experimental.pallas import tpu as pltpu

EPS = 1e-6


def _layer_norm_kernel(eps, x_ref, w_ref, b_ref, o_ref):
    x = x_ref[...].astype(jnp.float32)              # (NB, C, TL) single f32 copy
    u = jnp.mean(x, axis=1, keepdims=True)          # (NB, 1, TL) sublane reduce
    x = x - u                                       # old x dead -> buffer reusable in place
    s = jnp.mean(x * x, axis=1, keepdims=True)      # biased variance, two-pass (exact ref numerics)
    inv = jax.lax.rsqrt(s + eps)                    # EUP rsqrt, frees the VALU slot
    # (C, 1) affine params broadcast over batch (leading) and L (lanes).
    y = x * inv * w_ref[...] + b_ref[...]
    o_ref[...] = y.astype(o_ref.dtype)


def _vmem_capacity_bytes():
    try:
        return int(pltpu.get_tpu_info().vmem_capacity_bytes)
    except Exception:
        return 64 << 20                             # conservative (v7x per-TC)


def _pick_tiles(N, C, Lp, in_itemsize, out_itemsize):
    """Pick (NB, TL, vmem_limit_bytes) for a padded length Lp (multiple of 128).

    Budget counts double-buffered in/out tiles + ~2 block-sized f32 temporaries.
    NB is additionally capped so the grid keeps >= ~8 steps when possible
    (megacore sharding + pipelining)."""
    cap = _vmem_capacity_bytes()

    # --- L tile: a multiple of 128 that divides Lp, at most 1024 lanes wide.
    if Lp <= 1024:
        TL = Lp
    else:
        TL = 128
        for cand in range(1024, 127, -128):
            if Lp % cand == 0:
                TL = cand
                break
    l_steps = Lp // TL

    # --- per-batch-row block bytes: 2x(in+out) double-buffered + ~2 f32 temps.
    io_per_n = C * TL * (in_itemsize + out_itemsize) * 2
    tmp_per_n = 2 * C * TL * 4
    per_n = io_per_n + tmp_per_n

    block_budget = min(cap // 4, 16 << 20)          # generation-aware per-block budget
    nb_vmem = max(1, block_budget // per_n)

    # --- step-count floor: aim for >= 8 grid steps (or as many as possible).
    max_steps = N * l_steps
    target_steps = min(8, max_steps)
    need_batch_steps = max(1, -(-target_steps // l_steps))
    nb_steps = max(1, N // need_batch_steps)

    NB = int(max(1, min(N, nb_vmem, nb_steps)))

    # --- explicit scoped-VMEM limit sized from the honest accounting.
    block_total = NB * per_n + 4 * C * 4            # + double-buffered (C,1) f32 w/b
    vmem_limit = int(min(cap, max(32 << 20, block_total + (4 << 20))))
    return NB, TL, vmem_limit


def layer_norm(x, weight, bias, eps=EPS):
    """x: (N, C, L); weight, bias: (C,).  Returns (N, C, L) like the module."""
    N, C, L = x.shape

    # Keep output stores lane-dense: pad L up to a multiple of 128 if needed.
    Lp = -(-L // 128) * 128
    if Lp != L:
        x = jnp.pad(x, ((0, 0), (0, 0), (0, Lp - L)))

    NB, TL, vmem_limit = _pick_tiles(
        N, C, Lp, jnp.dtype(x.dtype).itemsize, jnp.dtype(x.dtype).itemsize)

    w2d = weight.reshape(C, 1).astype(jnp.float32)
    b2d = bias.reshape(C, 1).astype(jnp.float32)

    kernel = functools.partial(_layer_norm_kernel, eps)
    out = pl.pallas_call(
        kernel,
        out_shape=jax.ShapeDtypeStruct((N, C, Lp), x.dtype),
        grid_spec=pltpu.PrefetchScalarGridSpec(
            num_scalar_prefetch=0,
            grid=(pl.cdiv(N, NB), Lp // TL),
            in_specs=[
                pl.BlockSpec((NB, C, TL), lambda i, j: (i, 0, j)),
                pl.BlockSpec((C, 1), lambda i, j: (0, 0)),
                pl.BlockSpec((C, 1), lambda i, j: (0, 0)),
            ],
            out_specs=pl.BlockSpec((NB, C, TL), lambda i, j: (i, 0, j)),
        ),
        compiler_params=pltpu.CompilerParams(
            dimension_semantics=("parallel", "parallel"),
            vmem_limit_bytes=vmem_limit),
    )(x, w2d, b2d)

    if Lp != L:
        out = out[:, :, :L]
    return out


def reference(x, weight, bias, eps=EPS):
    """Pure-JAX transcription of the PyTorch forward."""
    u = jnp.mean(x, axis=1, keepdims=True)
    s = jnp.mean((x - u) ** 2, axis=1, keepdims=True)
    xn = (x - u) / jnp.sqrt(s + eps)
    return weight[:, None] * xn + bias[:, None]


if __name__ == "__main__":
    N, C, L = 2, 32, 128                            # batch, channels, length

    key = jax.random.PRNGKey(0)
    kx, kw, kb = jax.random.split(key, 3)
    x = jax.random.normal(kx, (N, C, L), jnp.float32)
    weight = 1.0 + 0.1 * jax.random.normal(kw, (C,), jnp.float32)
    bias = 0.1 * jax.random.normal(kb, (C,), jnp.float32)

    y = layer_norm(x, weight, bias)
    y = jax.block_until_ready(y)

    assert y.shape == (N, C, L), y.shape
    y_ref = reference(x, weight, bias)
    np.testing.assert_allclose(np.asarray(y), np.asarray(y_ref),
                               rtol=1e-4, atol=1e-4)
    print("KERNEL_OK")
</pallas_src>

<mosaic_0001>
module attributes {stable_mosaic.version = 11 : i64} {
  func.func @_layer_norm_kernel(%arg0: i32, %arg1: i32, %arg2: memref<1x32x128xf32, #tpu.memory_space<vmem>>, %arg3: memref<32x1xf32, #tpu.memory_space<vmem>>, %arg4: memref<32x1xf32, #tpu.memory_space<vmem>>, %arg5: memref<1x32x128xf32, #tpu.memory_space<vmem>>) attributes {dimension_semantics = [#tpu.dimension_semantics<parallel>, #tpu.dimension_semantics<parallel>], iteration_bounds = array<i64: 2, 1>, scalar_prefetch = 0 : i64, scratch_operands = 0 : i64, tpu.core_type = #tpu.core_type<tc>, window_params = [{transform_indices = @transform_0, window_bounds = array<i64: 1, 32, 128>}, {pipeline_mode = #tpu.pipeline_mode<synchronous>, transform_indices = @transform_1, window_bounds = array<i64: 32, 1>}, {pipeline_mode = #tpu.pipeline_mode<synchronous>, transform_indices = @transform_2, window_bounds = array<i64: 32, 1>}, {transform_indices = @transform_3, window_bounds = array<i64: 1, 32, 128>}]} {
    %c0 = arith.constant 0 : index
    %c0_0 = arith.constant 0 : index
    %c0_1 = arith.constant 0 : index
    %0 = vector.load %arg2[%c0, %c0_0, %c0_1] : memref<1x32x128xf32, #tpu.memory_space<vmem>>, vector<1x32x128xf32>
    %cst = arith.constant dense<0.000000e+00> : vector<1x128xf32>
    %1 = vector.multi_reduction <add>, %0, %cst [1] : vector<1x32x128xf32> to vector<1x128xf32>
    %2 = vector.shape_cast %1 : vector<1x128xf32> to vector<1x1x128xf32>
    %cst_2 = arith.constant 3.200000e+01 : f32
    %3 = vector.broadcast %cst_2 : f32 to vector<1x1x128xf32>
    %4 = arith.divf %2, %3 : vector<1x1x128xf32>
    %5 = vector.broadcast %4 : vector<1x1x128xf32> to vector<1x32x128xf32>
    %6 = arith.subf %0, %5 : vector<1x32x128xf32>
    %7 = arith.mulf %6, %6 : vector<1x32x128xf32>
    %cst_3 = arith.constant dense<0.000000e+00> : vector<1x128xf32>
    %8 = vector.multi_reduction <add>, %7, %cst_3 [1] : vector<1x32x128xf32> to vector<1x128xf32>
    %9 = vector.shape_cast %8 : vector<1x128xf32> to vector<1x1x128xf32>
    %cst_4 = arith.constant 3.200000e+01 : f32
    %10 = vector.broadcast %cst_4 : f32 to vector<1x1x128xf32>
    %11 = arith.divf %9, %10 : vector<1x1x128xf32>
    %cst_5 = arith.constant 9.99999997E-7 : f32
    %12 = vector.broadcast %cst_5 : f32 to vector<1x1x128xf32>
    %13 = arith.addf %11, %12 : vector<1x1x128xf32>
    %14 = math.rsqrt %13 : vector<1x1x128xf32>
    %15 = vector.broadcast %14 : vector<1x1x128xf32> to vector<1x32x128xf32>
    %16 = arith.mulf %6, %15 : vector<1x32x128xf32>
    %c0_6 = arith.constant 0 : index
    %c0_7 = arith.constant 0 : index
    %17 = vector.load %arg3[%c0_6, %c0_7] : memref<32x1xf32, #tpu.memory_space<vmem>>, vector<32x1xf32>
    %18 = vector.shape_cast %17 : vector<32x1xf32> to vector<1x32x1xf32>
    %19 = vector.broadcast %18 : vector<1x32x1xf32> to vector<1x32x128xf32>
    %20 = arith.mulf %16, %19 : vector<1x32x128xf32>
    %c0_8 = arith.constant 0 : index
    %c0_9 = arith.constant 0 : index
    %21 = vector.load %arg4[%c0_8, %c0_9] : memref<32x1xf32, #tpu.memory_space<vmem>>, vector<32x1xf32>
    %22 = vector.shape_cast %21 : vector<32x1xf32> to vector<1x32x1xf32>
    %23 = vector.broadcast %22 : vector<1x32x1xf32> to vector<1x32x128xf32>
    %24 = arith.addf %20, %23 : vector<1x32x128xf32>
    %c0_10 = arith.constant 0 : index
    %c0_11 = arith.constant 0 : index
    %c0_12 = arith.constant 0 : index
    %25 = vector.load %arg5[%c0_10, %c0_11, %c0_12] : memref<1x32x128xf32, #tpu.memory_space<vmem>>, vector<1x32x128xf32>
    tpu.vector_store %arg5[%c0_10, %c0_11, %c0_12], %24 {strides = array<i32>} : memref<1x32x128xf32, #tpu.memory_space<vmem>>, vector<1x32x128xf32>,
    return
  }
  func.func @transform_0(%arg0: i32, %arg1: i32) -> (i32, i32, i32) {
    %c0_i32 = arith.constant 0 : i32
    %c0_i32_0 = arith.constant 0 : i32
    return %arg0, %c0_i32, %arg1 : i32, i32, i32
  }
  func.func @transform_1(%arg0: i32, %arg1: i32) -> (i32, i32) {
    %c0_i32 = arith.constant 0 : i32
    %c0_i32_0 = arith.constant 0 : i32
    %c0_i32_1 = arith.constant 0 : i32
    return %c0_i32, %c0_i32_0 : i32, i32
  }
  func.func @transform_2(%arg0: i32, %arg1: i32) -> (i32, i32) {
    %c0_i32 = arith.constant 0 : i32
    %c0_i32_0 = arith.constant 0 : i32
    %c0_i32_1 = arith.constant 0 : i32
    return %c0_i32, %c0_i32_0 : i32, i32
  }
  func.func @transform_3(%arg0: i32, %arg1: i32) -> (i32, i32, i32) {
    %c0_i32 = arith.constant 0 : i32
    %c0_i32_0 = arith.constant 0 : i32
    return %arg0, %c0_i32, %arg1 : i32, i32, i32
  }
}

</mosaic_0001>

<bundles_post_ra>
// kernel: tpu_custom_call.1
= control target key start
LH: loop header
LB: loop body
LE: loop exit
PB: predicated region body
PF: predicated region fallthrough
CT: control target
= control target key end

     0   :  { %8 = vsyncpa [#allocation3], 0  ;;  %s706_s0 = inlined_call_operand.vmem [shape: f32[2,32,128], index: 0, kind: input, shape index: {}]   ;;  %s707_s1 = inlined_call_operand.vmem [shape: f32[32,1], index: 1, kind: input, shape index: {}]   ;;  %s708_s2 = inlined_call_operand.vmem [shape: f32[32,1], index: 2, kind: input, shape index: {}]   ;;  %s709_s3 = inlined_call_operand.hbm [shape: f32[2,32,128], index: 3, kind: output, shape index: {}]  }
   0x1   :  { %10 = vsyncpa [#allocation3 + $0x1], 0  ;;  %s567_s12 = smov 0   ;;  %s569_s13 = smov 0  }
   0x2   :  { %s571_s14 = smov 0   ;;  %s573_s15 = smov 0  }
   0x3   :  { %s575_s16 = smov 0   ;;  %s577_s17 = smov 0  }
   0x4 LB: > { %s386_s18 = sadd.s32 4294967295, %s541_s17   ;;  %s387_s19 = sadd.s32 4294967294, %s541_s17   ;;  %s541_s17 = sphi %s577_s17, %s16_s17   ;;  %s537_s16 = sphi %s575_s16, %s716_s16   ;;  %s533_s15 = sphi %s573_s15, %s715_s15   ;;  %s529_s14 = sphi %s571_s14, %s714_s14   ;;  %s525_s13 = sphi %s569_s13, %s713_s13   ;;  %s521_s12 = sphi %s567_s12, %s712_s12  }
   0x5   : > { %s28_s20 = sadd.s32 1, %s537_s16  ;;  %s107_s21 = sadd.s32 1, %s529_s14 }
   0x6   : > { %p30_p0 = scmp.ge.s32.totalorder %s28_s20, 2  ;;  %p117_p1 = scmp.ne.s32.totalorder %s529_s14, %s525_s13 }
   0x7   : > { %p118_p2 = scmp.eq.s32.totalorder %s386_s18, 1  ;;  %p123_p3 = scmp.ne.s32.totalorder %s525_s13, %s521_s12 }
   0x8   : > { %s718_s20 = smov (%p30_p0, %s28_s20), 0  ;;  %p124_p5 = scmp.eq.s32.totalorder %s387_s19, 1 }
   0x9   : > { %p607_p4 = por %p118_p2, %p117_p1  ;;  %s102_s23 = ssub.s32 %s537_s16, %s718_s20 }
   0xa   : > { %p390_p6 = scmp.ge.s32.totalorder %s541_s17, 1  ;;  %p105_p7 = scmp.eq.s32.totalorder %s102_s23, 0 }
   0xb   : > { %p614_p8 = por %p124_p5, %p123_p3  ;;  %p159_p9 = scmp.lt.s32.totalorder %s541_s17, 3 }
   0xc   : > { %s620_s25 = scalar_select %p105_p7, %s529_s14, %s107_s21  }
   0xd   : > { %p160_p10 = pnand %p390_p6, %p159_p9 }
   0xe   : > { %v235_v0 = vld [vmem:[%s707_s1 + $0x10] sm:$0xff] (!%p160_p10)  ;;  %v233_v1 = vld [vmem:[%s707_s1] sm:$0xff] (!%p160_p10)  ;;  %v543_v2 = vmov (!%p160_p10), 0   ;;  %v236_v3 = vld [vmem:[%s707_s1 + $0x18] sm:$0xff] (!%p160_p10)  ;;  %p186_p11 = scmp.lt.s32.totalorder (!%p160_p10), %s533_s15, 1  ;;  %s183_s30 = sand.u32 (!%p160_p10), 1, %s525_s13  }
   0xf   : > { %163 = sbr.rel (%p160_p10) target bundleno = 173 (0xad), region = 32  ;;  %460 = vset.pattern.permute.xlu1 (!%p160_p10), %v543_v2  ;;  %459 = vset.pattern.permute.xlu0 (!%p160_p10), %v543_v2  ;;  %v234_v4 = vld [vmem:[%s707_s1 + $0x8] sm:$0xff] (!%p160_p10)  ;;  %v261_v6 = vld [vmem:[%s708_s2] sm:$0xff] (!%p160_p10)  ;;  %v264_v7 = vld [vmem:[%s708_s2 + $0x18] sm:$0xff] (!%p160_p10)  ;;  %s391_s4 = sshll.u32 (!%p160_p10), %s183_s30, 5 }
  0x10   : > { %249 = vperm.xlu1 (!%p160_p10), %460, %v235_v0   ;;  %239 = vperm.xlu0 (!%p160_p10), %459, %v233_v1   ;;  %v262_v5 = vld [vmem:[%s708_s2 + $0x8] sm:$0xff] (!%p160_p10)  ;;  %v263_v8 = vld [vmem:[%s708_s2 + $0x10] sm:$0xff] (!%p160_p10)  ;;  %s185_s5 = scalar_lea.vmem (!%p160_p10), [#allocation2], %s391_s4  ;;  %s400_s7 = sshll.u32 (!%p160_p10), %s533_s15, 9 }
  0x11   : > { %s308_s6 = sshll.u32 (!%p160_p10), %s185_s5, 4  ;;  %s658_s10 = scalar_lea.hbm (!%p160_p10), %s709_s3, %s400_s7  ;;  %s653_s6 = int_to_ptr.vmem [resolvable:$true] %s308_s6 }
  0x12   : > { %s463_s11 = scalar_lea.vmem (!%p160_p10), %s653_s6, 512  ;;  %s544_s18 = smov (!%p160_p10), [#allocation2]  }
  0x13   : > { %p464_p12 = scmp.ne.s32.totalorder (!%p160_p10), %s653_s6, %s463_s11  ;;  %s467_s19 = sshll.u32 (!%p160_p10), %s544_s18, 4  ;;  %s468_s19 = int_to_ptr.vmem [resolvable:$false] %s467_s19 }
  0x14   : > { %254 = vperm.xlu1 (!%p160_p10), %460, %v236_v3   ;;  %244 = vperm.xlu0 (!%p160_p10), %459, %v234_v4   ;;  %s469_s21 = scalar_lea.vmem (!%p160_p10), %s468_s19, 1024  ;;  %p470_p1 = scmp.lt.s32.totalorder (!%p160_p10), %s653_s6, %s468_s19 }
  0x15   : > { %p465_p13 = pnand (!%p160_p10), %p464_p12, %p607_p4  ;;  %p471_p2 = scmp.lt.s32.totalorder (!%p160_p10), %s469_s21, %s463_s11 }
  0x16   : > { %s187_s23 = scalar_select %p186_p11, %s533_s15, 1 }
  0x17   : > { %s660_s15 = scalar_lea.sflag [#allocation3], %s183_s30  ;;  %p466_p0 = pneg %p465_p13 }
  0x18   : > { %272 = vperm.xlu1 %460, %v262_v5   ;;  %267 = vperm.xlu0 %459, %v261_v6   ;;  %s399_s26 = sshll.u32 %s187_s23, 5  ;;  %p472_p3 = por %p471_p2, %p470_p1 }
  0x19   : > { %s193_s29 = scalar_lea.vmem %s706_s0, %s399_s26 }
  0x1a   : > { %v194_v9 = vld [vmem:[%s193_s29] sm:$0xff]  ;;  %v195_v10 = vld [vmem:[%s193_s29 + $0x8] sm:$0xff]  ;;  %v196_v12 = vld [vmem:[%s193_s29 + $0x10] sm:$0xff]  ;;  %p473_p5 = pnand %p472_p3, %p466_p0 }
  0x1b   : > { %v198_v11 = vadd.f32 %v195_v10, %v194_v9  ;;  %v197_v14 = vld [vmem:[%s193_s29 + $0x18] sm:$0xff] }
  0x1c   : > { %282 = vperm.xlu1 %460, %v264_v7   ;;  %277 = vperm.xlu0 %459, %v263_v8  }
  0x1d   : > { %v199_v13 = vadd.f32 %v198_v11, %v196_v12 }
  0x1f   : > { %v200_v15 = vadd.f32 %v199_v13, %v197_v14 }
  0x21   : > { %v201_v16 = vrot.slane %v200_v15, 4 }
  0x23   : > { %v202_v17 = vadd.f32 %v201_v16, %v200_v15 }
  0x25   : > { %v203_v18 = vrot.slane %v202_v17, 2 }
  0x27   : > { %v204_v19 = vadd.f32 %v203_v18, %v202_v17 }
  0x29   : > { %v205_v20 = vrot.slane %v204_v19, 1 }
  0x2b   : > { %v206_v21 = vadd.f32 %v205_v20, %v204_v19 }
  0x2d   : > { %v208_v22 = vmul.f32 0.03125, %v206_v21 }
  0x2f   : > { %v209_v23 = vsub.f32 %v194_v9, %v208_v22  ;;  %v210_v24 = vsub.f32 %v195_v10, %v208_v22  ;;  %v211_v25 = vsub.f32 %v196_v12, %v208_v22  ;;  %v212_v28 = vsub.f32 %v197_v14, %v208_v22 }
  0x31   : > { %v213_v26 = vmul.f32 %v209_v23, %v209_v23  ;;  %v214_v27 = vmul.f32 %v210_v24, %v210_v24  ;;  %v215_v29 = vmul.f32 %v211_v25, %v211_v25  ;;  %v216_v31 = vmul.f32 %v212_v28, %v212_v28 }
  0x33   : > { %v217_v30 = vadd.f32 %v214_v27, %v213_v26 }
  0x35   : > { %v218_v32 = vadd.f32 %v217_v30, %v215_v29 }
  0x37   : > { %v219_v33 = vadd.f32 %v218_v32, %v216_v31 }
  0x39   : > { %v220_v34 = vrot.slane %v219_v33, 4 }
  0x3b   : > { %v221_v35 = vadd.f32 %v220_v34, %v219_v33 }
  0x3d   : > { %v222_v36 = vrot.slane %v221_v35, 2 }
  0x3f   : > { %v223_v37 = vadd.f32 %v222_v36, %v221_v35 }
  0x41   : > { %v224_v38 = vrot.slane %v223_v37, 1 }
  0x43   : > { %v225_v39 = vadd.f32 %v224_v38, %v223_v37 }
  0x45   : > { %v226_v40 = vmul.f32 0.03125, %v225_v39 }
  0x47   : > { %v227_v41 = vadd.f32 1e-06, %v226_v40 }
  0x49   : > { %461 = vrsqrt.f32 %v227_v41 }
  0x53   : > { %v462_v42 = vpop.eup %461 }
  0x54   : > { %v229_v45 = vmul.f32 %v462_v42, %v209_v23  ;;  %v230_v46 = vmul.f32 %v462_v42, %v210_v24  ;;  %v231_v49 = vmul.f32 %v462_v42, %v211_v25  ;;  %v232_v51 = vmul.f32 %v462_v42, %v212_v28 }
  0x8f   : > { %v250_v43 = vpop.permute.xlu1 %249  ;;  %v240_v44 = vpop.permute.xlu0 %239 }
  0x90   : > { %v257_v50 = vmul.f32 %v240_v44, %v229_v45  ;;  %v259_v57 = vmul.f32 %v250_v43, %v231_v49 }
  0x93   : > { %v255_v47 = vpop.permute.xlu1 %254  ;;  %v245_v48 = vpop.permute.xlu0 %244 }
  0x94   : > { %v258_v52 = vmul.f32 %v245_v48, %v230_v46  ;;  %v260_v58 = vmul.f32 %v255_v47, %v232_v51 }
  0x97   : > { %v273_v53 = vpop.permute.xlu1 %272  ;;  %v268_v54 = vpop.permute.xlu0 %267 }
  0x98   : > { %v286_v55 = vadd.f32 %v273_v53, %v258_v52  ;;  %v285_v56 = vadd.f32 %v268_v54, %v257_v50 }
  0x9a   : > { %290 = vst [vmem:[%s185_s5 + $0x8] sm:$0xff] %v286_v55  ;;  %289 = vst [vmem:[%s185_s5] sm:$0xff] %v285_v56 }
  0x9b   : > { %v283_v59 = vpop.permute.xlu1 %282  ;;  %v278_v60 = vpop.permute.xlu0 %277 }
  0x9c   : > { %v288_v61 = vadd.f32 %v283_v59, %v260_v58  ;;  %v287_v62 = vadd.f32 %v278_v60, %v259_v57 }
  0x9e   : > { %292 = vst [vmem:[%s185_s5 + $0x18] sm:$0xff] %v288_v61  ;;  %291 = vst [vmem:[%s185_s5 + $0x10] sm:$0xff] %v287_v62 }
  0x9f   : > { %476 = shalt.err (!%p473_p5)
}
  0xa0   : > { %s477_s23 = scalar_lea.hbm %s658_s10, 512  ;;  %s481_s28 = scalar_lea.hbm %s709_s3, 1024 }
  0xa1   : > { %p478_p6 = scmp.ne.s32.totalorder %s658_s10, %s477_s23  ;;  %p482_p10 = scmp.lt.u32.totalorder %s658_s10, %s709_s3 }
  0xa2   : > { %p483_p11 = scmp.lt.u32.totalorder %s481_s28, %s477_s23  ;;  %p485_p13 = scmp.lt.u32.totalorder %s477_s23, %s658_s10 }
  0xa3   : > { %p479_p7 = pnand %p478_p6, %p607_p4 }
  0xa4   : > { %p484_p12 = por %p483_p11, %p482_p10 }
  0xa5   : > { %p480_p9 = pneg %p479_p7 }
  0xa6   : > { %p486_p0 = por %p485_p13, %p484_p12 }
  0xa8   : > { %p487_p1 = pnand %p486_p0, %p480_p9 }
  0xaa   : > { %490 = shalt.err (!%p487_p1)
}
  0xab   : > { %s545_s4 = smov 128   ;;  %s546_s5 = smov 8  }
  0xac   : > { %401 = dma.vmem_to_hbm [thread:$0]  (%p607_p4), %s653_s6, 512, %s658_s10, %s660_s15, %s545_s4, %s545_s4, %s546_s5  }
  0xad PF: > { %p407_p2 = scmp.ge.s32.totalorder %s541_s17, 2  ;;  %s323_s7 = sand.u32 1, %s521_s12  }
  0xae   : > { %s324_s8 = scalar_lea.sflag [#allocation3], %s323_s7 }
  0xaf   : > { %p404_p3 = pnand %p407_p2, %p614_p8 }
  0xb1   : > { %516 = dma.done.wait (!%p404_p3), %s324_s8, 512  }
  0xb2   : > { %518 = vsyncadd (!%p404_p3), %s324_s8, 4294966784  ;;  %s16_s17 = sadd.s32 1, %s541_s17   ;;  %s712_s12 = smov %s525_s13 }
  0xb3   : > { %p13_p5 = scmp.ge.s32.totalorder %s16_s17, 4   ;;  %s713_s13 = smov %s529_s14 }
  0xb4   : > { %s714_s14 = smov %s620_s25  ;;  %s715_s15 = smov %s537_s16 }
  0xb5   : > { %s716_s16 = smov %s718_s20  ;;  %15 = sbr.rel (!%p13_p5) target bundleno = 4 (0x4), region = 67 }
  0xbc   :  { %329 = vsyncpa [#allocation3], 1 }
  0xbd   :  { %331 = vsyncpa [#allocation3 + $0x1], 1 }

</bundles_post_ra>
